<compile_context>
chip_gen: v6e
topology: v6e:2x2x1
jax: 0.10.0
libtpu: 0.0.40
codegen_flags: <defaults>
</compile_context>

<pallas_src>
import functools

import jax
import jax.numpy as jnp
from jax import lax
from jax.experimental import pallas as pl
from jax.experimental.pallas import tpu as pltpu

LANES = 128
SUBLANES = 8
VREG_ELEMS = SUBLANES * LANES          # 1024: kernel domain aligned to one f32 vreg
SLAB_ROWS = 128                        # rows per in-kernel streaming chunk
MAX_TILE_ROWS = 4096                   # 4096 x 128 f32 = 2 MiB per stream per buffer


def _round_up(x, m):
    return ((x + m - 1) // m) * m


def _bbce_sums_kernel(pred_ref, gt_ref,
                      out_gt_ref, out_pos_ref, out_neg_ref,
                      acc_gt, acc_pos, acc_neg,
                      *, rows_valid, g_inner):
    c = pl.program_id(0)               # parallel split (v7x: one per TensorCore)
    i = pl.program_id(1)               # sequential reduction axis
    tile_rows = pred_ref.shape[0]

    @pl.when(i == 0)
    def _init():
        acc_gt[...] = jnp.zeros_like(acc_gt)
        acc_pos[...] = jnp.zeros_like(acc_pos)
        acc_neg[...] = jnp.zeros_like(acc_neg)

    # Logical (unclamped) row offset of this grid step.  Masking is row-based,
    # so int32 is safe for any n < ~2.7e11 elements.
    block_row_start = (c * g_inner + i) * tile_rows

    def chunk(row_off, n_rows, masked):
        x = pred_ref[pl.ds(row_off, n_rows), :].astype(jnp.float32)
        y = gt_ref[pl.ds(row_off, n_rows), :].astype(jnp.float32)
        if masked:
            row = lax.broadcasted_iota(jnp.int32, (n_rows, LANES), 0)
            valid = (block_row_start + row_off + row) < rows_valid
            # Mask x too: garbage rows in a boundary/phantom block would
            # otherwise poison exp/log1p even when multiplied by zero.
            x = jnp.where(valid, x, 0.0)
            y = jnp.where(valid, y, 0.0)
            om = jnp.where(valid, 1.0 - y, 0.0)
        else:
            om = 1.0 - y
        # Numerically stable softplus; softplus(x) = softplus(-x) + x.
        sp_neg = jnp.maximum(-x, 0.0) + jnp.log1p(jnp.exp(-jnp.abs(x)))  # -log sigmoid(x)
        sp_pos = sp_neg + x                                              # -log(1-sigmoid(x))
        # Fold the (n_rows,128) contributions into the (8,128) partials with
        # per-vreg VALU adds (the reshape is a free sublane-block regrouping).
        acc_gt[...] += jnp.sum(y.reshape(-1, SUBLANES, LANES), axis=0)
        acc_pos[...] += jnp.sum((y * sp_neg).reshape(-1, SUBLANES, LANES), axis=0)
        acc_neg[...] += jnp.sum((om * sp_pos).reshape(-1, SUBLANES, LANES), axis=0)

    n_slabs = tile_rows // SLAB_ROWS
    rem_rows = tile_rows % SLAB_ROWS          # static; always a multiple of 8

    def run_block(masked):
        if n_slabs > 0:
            def body(s, carry):
                chunk(pl.multiple_of(s * SLAB_ROWS, SLAB_ROWS), SLAB_ROWS, masked)
                return carry
            lax.fori_loop(0, n_slabs, body, 0)
        if rem_rows:
            chunk(n_slabs * SLAB_ROWS, rem_rows, masked)

    is_full = block_row_start + tile_rows <= rows_valid

    @pl.when(is_full)
    def _fast():                       # all rows valid: unmasked fast path
        run_block(masked=False)

    @pl.when(jnp.logical_not(is_full))
    def _boundary():                   # boundary / phantom block: row mask
        run_block(masked=True)

    @pl.when(i == pl.num_programs(1) - 1)
    def _finalize():                   # one tiny (8,128) store per split
        out_gt_ref[...] = acc_gt[...].reshape(1, SUBLANES, LANES)
        out_pos_ref[...] = acc_pos[...].reshape(1, SUBLANES, LANES)
        out_neg_ref[...] = acc_neg[...].reshape(1, SUBLANES, LANES)


def _partial_sums_jax(x, y):
    """Tiny pure-JAX fold used for the <=1023-element unaligned tail."""
    x = x.astype(jnp.float32)
    y = y.astype(jnp.float32)
    sp_neg = jnp.maximum(-x, 0.0) + jnp.log1p(jnp.exp(-jnp.abs(x)))
    sp_pos = sp_neg + x
    return jnp.sum(y), jnp.sum(y * sp_neg), jnp.sum((1.0 - y) * sp_pos)


def bbce_with_logit_loss(pred, gt):
    """Balanced BCEWithLogitLoss — exact semantics of the PyTorch module."""
    eps = 1e-10
    assert pred.shape == gt.shape
    n = pred.size                              # static Python int

    pred_flat = pred.reshape(-1)
    gt_flat = gt.reshape(-1)

    # Kernel domain: the prefix aligned to one f32 vreg (1024 elements).
    # No jnp.pad copy; the short tail is folded in below with plain JAX.
    n_main = (n // VREG_ELEMS) * VREG_ELEMS
    rows = n_main // LANES                     # always a multiple of 8

    sum_gt = jnp.float32(0.0)
    s_pos = jnp.float32(0.0)
    s_neg = jnp.float32(0.0)

    if rows > 0:
        pred2 = pred_flat[:n_main].reshape(rows, LANES)   # contiguous prefix view
        gt2 = gt_flat[:n_main].reshape(rows, LANES)

        # Tile rows: full array if small; otherwise balanced blocks rounded to
        # a multiple of SLAB_ROWS so the last block isn't nearly empty.
        if rows <= MAX_TILE_ROWS:
            tile_rows = rows
        else:
            n_blocks_target = pl.cdiv(rows, MAX_TILE_ROWS)
            tile_rows = _round_up(pl.cdiv(rows, n_blocks_target), SLAB_ROWS)

        g_total = pl.cdiv(rows, tile_rows)
        # Leading parallel axis: v7x's 2 TensorCores each take half the blocks
        # (harmless short sequential outer loop on 1-TC v5e/v6e).
        num_splits = 2 if g_total >= 2 else 1
        g_inner = pl.cdiv(g_total, num_splits)

        def in_map(c, i):
            # Clamp so phantom steps (odd block counts) DMA a valid block;
            # their contribution is fully masked out in-kernel.
            return (jnp.minimum(c * g_inner + i, g_total - 1), 0)

        tile_spec = pl.BlockSpec((tile_rows, LANES), in_map)
        out_shape = jax.ShapeDtypeStruct((num_splits, SUBLANES, LANES), jnp.float32)
        out_spec = pl.BlockSpec((1, SUBLANES, LANES), lambda c, i: (c, 0, 0))
        acc_spec = pltpu.VMEM((SUBLANES, LANES), jnp.float32)

        kernel = functools.partial(_bbce_sums_kernel, rows_valid=rows, g_inner=g_inner)

        part_gt, part_pos, part_neg = pl.pallas_call(
            kernel,
            out_shape=(out_shape, out_shape, out_shape),
            grid_spec=pltpu.PrefetchScalarGridSpec(
                num_scalar_prefetch=0,
                grid=(num_splits, g_inner),
                in_specs=[tile_spec, tile_spec],
                out_specs=[out_spec, out_spec, out_spec],
                scratch_shapes=[acc_spec, acc_spec, acc_spec],
            ),
            compiler_params=pltpu.CompilerParams(
                dimension_semantics=("parallel", "arbitrary"),
                vmem_limit_bytes=32 * 1024 * 1024,
            ),
        )(pred2, gt2)

        # Tiny cross-lane reduction of the per-core (8,128) partials in JAX.
        sum_gt = jnp.sum(part_gt)
        s_pos = jnp.sum(part_pos)
        s_neg = jnp.sum(part_neg)

    if n_main < n:   # unaligned tail: < 1024 elements of trivial JAX work
        t_gt, t_pos, t_neg = _partial_sums_jax(pred_flat[n_main:], gt_flat[n_main:])
        sum_gt = sum_gt + t_gt
        s_pos = s_pos + t_pos
        s_neg = s_neg + t_neg

    count_pos = sum_gt + eps
    count_neg = jnp.float32(n) - sum_gt        # == sum(1 - gt); saves an accumulator
    ratio = count_neg / count_pos
    w_neg = count_pos / (count_pos + count_neg)
    mean_bce = (ratio * s_pos + s_neg) / jnp.float32(n)
    return w_neg * mean_bce


def _bbce_reference(pred, gt):
    # Pure-JAX reference mirroring torch semantics (silent sanity check).
    eps = 1e-10
    count_pos = jnp.sum(gt) + eps
    count_neg = jnp.sum(1.0 - gt)
    ratio = count_neg / count_pos
    w_neg = count_pos / (count_pos + count_neg)
    log1p_term = jnp.log1p(jnp.exp(-jnp.abs(pred)))
    sp_neg = jnp.maximum(-pred, 0.0) + log1p_term
    sp_pos = jnp.maximum(pred, 0.0) + log1p_term
    per_elem = ratio * gt * sp_neg + (1.0 - gt) * sp_pos
    return w_neg * jnp.mean(per_elem)


if __name__ == "__main__":
    key = jax.random.PRNGKey(0)
    ks = jax.random.split(key, 8)

    def check(pred, gt):
        loss = jax.block_until_ready(bbce_with_logit_loss(pred, gt))
        ref = _bbce_reference(pred.astype(jnp.float32), gt.astype(jnp.float32))
        assert jnp.allclose(loss, ref, rtol=2e-4, atol=1e-6), (loss, ref)

    # Primary case: small NCHW logits with {0,1} targets (single full block).
    shape = (2, 4, 16, 16)
    check(jax.random.normal(ks[0], shape, dtype=jnp.float32),
          (jax.random.uniform(ks[1], shape) > 0.7).astype(jnp.float32))

    # Multi-block case: exercises the 2-way parallel split + masked boundary block.
    shape2 = (2, 8, 200, 200)   # 640000 elems -> 5000 rows -> 2 blocks of 2560
    check(jax.random.normal(ks[2], shape2, dtype=jnp.float32),
          (jax.random.uniform(ks[3], shape2) > 0.5).astype(jnp.float32))

    # Unaligned case: n % 1024 != 0 (kernel prefix + tiny JAX tail fold).
    shape3 = (2, 8, 100, 100)   # 160000 elems -> 1248 aligned rows + 256-elem tail
    check(jax.random.normal(ks[4], shape3, dtype=jnp.float32),
          (jax.random.uniform(ks[5], shape3) > 0.6).astype(jnp.float32))

    # Tiny case: n < 1024 -> pure-JAX fallback path (no kernel launch needed).
    shape4 = (1, 3, 5, 7)       # 105 elems
    check(jax.random.normal(ks[6], shape4, dtype=jnp.float32),
          (jax.random.uniform(ks[7], shape4) > 0.6).astype(jnp.float32))

    print("KERNEL_OK")
</pallas_src>

<mosaic_0001>
module attributes {stable_mosaic.version = 11 : i64} {
  func.func @_bbce_sums_kernel(%arg0: i32, %arg1: i32, %arg2: memref<16x128xf32, #tpu.memory_space<vmem>>, %arg3: memref<16x128xf32, #tpu.memory_space<vmem>>, %arg4: memref<1x8x128xf32, #tpu.memory_space<vmem>>, %arg5: memref<1x8x128xf32, #tpu.memory_space<vmem>>, %arg6: memref<1x8x128xf32, #tpu.memory_space<vmem>>, %arg7: memref<8x128xf32, #tpu.memory_space<vmem>>, %arg8: memref<8x128xf32, #tpu.memory_space<vmem>>, %arg9: memref<8x128xf32, #tpu.memory_space<vmem>>) attributes {dimension_semantics = [#tpu.dimension_semantics<parallel>, #tpu.dimension_semantics<arbitrary>], iteration_bounds = array<i64: 1, 1>, scalar_prefetch = 0 : i64, scratch_operands = 3 : i64, tpu.core_type = #tpu.core_type<tc>, window_params = [{transform_indices = @transform_0, window_bounds = array<i64: 16, 128>}, {transform_indices = @transform_1, window_bounds = array<i64: 16, 128>}, {transform_indices = @transform_2, window_bounds = array<i64: 1, 8, 128>}, {transform_indices = @transform_3, window_bounds = array<i64: 1, 8, 128>}, {transform_indices = @transform_4, window_bounds = array<i64: 1, 8, 128>}]} {
    %c0_i32 = arith.constant 0 : i32
    %0 = arith.cmpi eq, %arg1, %c0_i32 : i32
    %1 = arith.extui %0 : i1 to i32
    %c0_i32_0 = arith.constant 0 : i32
    %2 = arith.cmpi ne, %1, %c0_i32_0 : i32
    scf.if %2 {
      %cst = arith.constant 0.000000e+00 : f32
      %16 = vector.broadcast %cst : f32 to vector<8x128xf32>
      %c0 = arith.constant 0 : index
      %c0_7 = arith.constant 0 : index
      %17 = vector.load %arg7[%c0, %c0_7] : memref<8x128xf32, #tpu.memory_space<vmem>>, vector<8x128xf32>
      tpu.vector_store %arg7[%c0, %c0_7], %16 {strides = array<i32>} : memref<8x128xf32, #tpu.memory_space<vmem>>, vector<8x128xf32>,
      %cst_8 = arith.constant 0.000000e+00 : f32
      %18 = vector.broadcast %cst_8 : f32 to vector<8x128xf32>
      %c0_9 = arith.constant 0 : index
      %c0_10 = arith.constant 0 : index
      %19 = vector.load %arg8[%c0_9, %c0_10] : memref<8x128xf32, #tpu.memory_space<vmem>>, vector<8x128xf32>
      tpu.vector_store %arg8[%c0_9, %c0_10], %18 {strides = array<i32>} : memref<8x128xf32, #tpu.memory_space<vmem>>, vector<8x128xf32>,
      %cst_11 = arith.constant 0.000000e+00 : f32
      %20 = vector.broadcast %cst_11 : f32 to vector<8x128xf32>
      %c0_12 = arith.constant 0 : index
      %c0_13 = arith.constant 0 : index
      %21 = vector.load %arg9[%c0_12, %c0_13] : memref<8x128xf32, #tpu.memory_space<vmem>>, vector<8x128xf32>
      tpu.vector_store %arg9[%c0_12, %c0_13], %20 {strides = array<i32>} : memref<8x128xf32, #tpu.memory_space<vmem>>, vector<8x128xf32>,
    } else {
    }
    %c1_i32 = arith.constant 1 : i32
    %3 = arith.muli %arg0, %c1_i32 : i32
    %4 = arith.addi %3, %arg1 : i32
    %c16_i32 = arith.constant 16 : i32
    %5 = arith.muli %4, %c16_i32 : i32
    %c16_i32_1 = arith.constant 16 : i32
    %6 = arith.addi %5, %c16_i32_1 : i32
    %c16_i32_2 = arith.constant 16 : i32
    %7 = arith.cmpi sle, %6, %c16_i32_2 : i32
    %8 = arith.extui %7 : i1 to i32
    %c0_i32_3 = arith.constant 0 : i32
    %9 = arith.cmpi ne, %8, %c0_i32_3 : i32
    scf.if %9 {
      %c0 = arith.constant 0 : index
      %c0_7 = arith.constant 0 : index
      %16 = vector.load %arg2[%c0, %c0_7] : memref<16x128xf32, #tpu.memory_space<vmem>>, vector<16x128xf32>
      %c0_8 = arith.constant 0 : index
      %c0_9 = arith.constant 0 : index
      %17 = vector.load %arg3[%c0_8, %c0_9] : memref<16x128xf32, #tpu.memory_space<vmem>>, vector<16x128xf32>
      %cst = arith.constant 1.000000e+00 : f32
      %18 = vector.broadcast %cst : f32 to vector<16x128xf32>
      %19 = arith.subf %18, %17 : vector<16x128xf32>
      %cst_10 = arith.constant 0.000000e+00 : f32
      %20 = vector.broadcast %cst_10 : f32 to vector<16x128xf32>
      %21 = arith.subf %20, %16 : vector<16x128xf32>
      %cst_11 = arith.constant 0.000000e+00 : f32
      %22 = vector.broadcast %cst_11 : f32 to vector<16x128xf32>
      %23 = arith.maximumf %21, %22 : vector<16x128xf32>
      %24 = math.absf %16 : vector<16x128xf32>
      %cst_12 = arith.constant 0.000000e+00 : f32
      %25 = vector.broadcast %cst_12 : f32 to vector<16x128xf32>
      %26 = arith.subf %25, %24 : vector<16x128xf32>
      %27 = math.exp %26 : vector<16x128xf32>
      %28 = math.log1p %27 : vector<16x128xf32>
      %29 = arith.addf %23, %28 : vector<16x128xf32>
      %30 = arith.addf %29, %16 : vector<16x128xf32>
      %c0_13 = arith.constant 0 : index
      %c0_14 = arith.constant 0 : index
      %31 = vector.load %arg7[%c0_13, %c0_14] : memref<8x128xf32, #tpu.memory_space<vmem>>, vector<8x128xf32>
      %32 = vector.shape_cast %17 : vector<16x128xf32> to vector<2x8x128xf32>
      %cst_15 = arith.constant dense<0.000000e+00> : vector<8x128xf32>
      %33 = vector.multi_reduction <add>, %32, %cst_15 [0] : vector<2x8x128xf32> to vector<8x128xf32>
      %34 = arith.addf %31, %33 : vector<8x128xf32>
      %c0_16 = arith.constant 0 : index
      %c0_17 = arith.constant 0 : index
      %35 = vector.load %arg7[%c0_16, %c0_17] : memref<8x128xf32, #tpu.memory_space<vmem>>, vector<8x128xf32>
      tpu.vector_store %arg7[%c0_16, %c0_17], %34 {strides = array<i32>} : memref<8x128xf32, #tpu.memory_space<vmem>>, vector<8x128xf32>,
      %c0_18 = arith.constant 0 : index
      %c0_19 = arith.constant 0 : index
      %36 = vector.load %arg8[%c0_18, %c0_19] : memref<8x128xf32, #tpu.memory_space<vmem>>, vector<8x128xf32>
      %37 = arith.mulf %17, %29 : vector<16x128xf32>
      %38 = vector.shape_cast %37 : vector<16x128xf32> to vector<2x8x128xf32>
      %cst_20 = arith.constant dense<0.000000e+00> : vector<8x128xf32>
      %39 = vector.multi_reduction <add>, %38, %cst_20 [0] : vector<2x8x128xf32> to vector<8x128xf32>
      %40 = arith.addf %36, %39 : vector<8x128xf32>
      %c0_21 = arith.constant 0 : index
      %c0_22 = arith.constant 0 : index
      %41 = vector.load %arg8[%c0_21, %c0_22] : memref<8x128xf32, #tpu.memory_space<vmem>>, vector<8x128xf32>
      tpu.vector_store %arg8[%c0_21, %c0_22], %40 {strides = array<i32>} : memref<8x128xf32, #tpu.memory_space<vmem>>, vector<8x128xf32>,
      %c0_23 = arith.constant 0 : index
      %c0_24 = arith.constant 0 : index
      %42 = vector.load %arg9[%c0_23, %c0_24] : memref<8x128xf32, #tpu.memory_space<vmem>>, vector<8x128xf32>
      %43 = arith.mulf %19, %30 : vector<16x128xf32>
      %44 = vector.shape_cast %43 : vector<16x128xf32> to vector<2x8x128xf32>
      %cst_25 = arith.constant dense<0.000000e+00> : vector<8x128xf32>
      %45 = vector.multi_reduction <add>, %44, %cst_25 [0] : vector<2x8x128xf32> to vector<8x128xf32>
      %46 = arith.addf %42, %45 : vector<8x128xf32>
      %c0_26 = arith.constant 0 : index
      %c0_27 = arith.constant 0 : index
      %47 = vector.load %arg9[%c0_26, %c0_27] : memref<8x128xf32, #tpu.memory_space<vmem>>, vector<8x128xf32>
      tpu.vector_store %arg9[%c0_26, %c0_27], %46 {strides = array<i32>} : memref<8x128xf32, #tpu.memory_space<vmem>>, vector<8x128xf32>,
    } else {
    }
    %true = arith.constant true
    %10 = arith.xori %7, %true : i1
    %11 = arith.extui %10 : i1 to i32
    %c0_i32_4 = arith.constant 0 : i32
    %12 = arith.cmpi ne, %11, %c0_i32_4 : i32
    scf.if %12 {
      %c0 = arith.constant 0 : index
      %c0_7 = arith.constant 0 : index
      %16 = vector.load %arg2[%c0, %c0_7] : memref<16x128xf32, #tpu.memory_space<vmem>>, vector<16x128xf32>
      %c0_8 = arith.constant 0 : index
      %c0_9 = arith.constant 0 : index
      %17 = vector.load %arg3[%c0_8, %c0_9] : memref<16x128xf32, #tpu.memory_space<vmem>>, vector<16x128xf32>
      %18 = tpu.iota {dimensions = array<i32: 0>} : vector<16x128xi32>
      %c0_i32_10 = arith.constant 0 : i32
      %19 = arith.addi %5, %c0_i32_10 : i32
      %20 = vector.broadcast %19 : i32 to vector<16x128xi32>
      %21 = arith.addi %20, %18 : vector<16x128xi32>
      %c16_i32_11 = arith.constant 16 : i32
      %22 = vector.broadcast %c16_i32_11 : i32 to vector<16x128xi32>
      %23 = arith.cmpi slt, %21, %22 : vector<16x128xi32>
      %cst = arith.constant 0.000000e+00 : f32
      %24 = vector.broadcast %cst : f32 to vector<16x128xf32>
      %25 = arith.select %23, %16, %24 : vector<16x128xi1>, vector<16x128xf32>
      %cst_12 = arith.constant 0.000000e+00 : f32
      %26 = vector.broadcast %cst_12 : f32 to vector<16x128xf32>
      %27 = arith.select %23, %17, %26 : vector<16x128xi1>, vector<16x128xf32>
      %cst_13 = arith.constant 1.000000e+00 : f32
      %28 = vector.broadcast %cst_13 : f32 to vector<16x128xf32>
      %29 = arith.subf %28, %27 : vector<16x128xf32>
      %cst_14 = arith.constant 0.000000e+00 : f32
      %30 = vector.broadcast %cst_14 : f32 to vector<16x128xf32>
      %31 = arith.select %23, %29, %30 : vector<16x128xi1>, vector<16x128xf32>
      %cst_15 = arith.constant 0.000000e+00 : f32
      %32 = vector.broadcast %cst_15 : f32 to vector<16x128xf32>
      %33 = arith.subf %32, %25 : vector<16x128xf32>
      %cst_16 = arith.constant 0.000000e+00 : f32
      %34 = vector.broadcast %cst_16 : f32 to vector<16x128xf32>
      %35 = arith.maximumf %33, %34 : vector<16x128xf32>
      %36 = math.absf %25 : vector<16x128xf32>
      %cst_17 = arith.constant 0.000000e+00 : f32
      %37 = vector.broadcast %cst_17 : f32 to vector<16x128xf32>
      %38 = arith.subf %37, %36 : vector<16x128xf32>
      %39 = math.exp %38 : vector<16x128xf32>
      %40 = math.log1p %39 : vector<16x128xf32>
      %41 = arith.addf %35, %40 : vector<16x128xf32>
      %42 = arith.addf %41, %25 : vector<16x128xf32>
      %c0_18 = arith.constant 0 : index
      %c0_19 = arith.constant 0 : index
      %43 = vector.load %arg7[%c0_18, %c0_19] : memref<8x128xf32, #tpu.memory_space<vmem>>, vector<8x128xf32>
      %44 = vector.shape_cast %27 : vector<16x128xf32> to vector<2x8x128xf32>
      %cst_20 = arith.constant dense<0.000000e+00> : vector<8x128xf32>
      %45 = vector.multi_reduction <add>, %44, %cst_20 [0] : vector<2x8x128xf32> to vector<8x128xf32>
      %46 = arith.addf %43, %45 : vector<8x128xf32>
      %c0_21 = arith.constant 0 : index
      %c0_22 = arith.constant 0 : index
      %47 = vector.load %arg7[%c0_21, %c0_22] : memref<8x128xf32, #tpu.memory_space<vmem>>, vector<8x128xf32>
      tpu.vector_store %arg7[%c0_21, %c0_22], %46 {strides = array<i32>} : memref<8x128xf32, #tpu.memory_space<vmem>>, vector<8x128xf32>,
      %c0_23 = arith.constant 0 : index
      %c0_24 = arith.constant 0 : index
      %48 = vector.load %arg8[%c0_23, %c0_24] : memref<8x128xf32, #tpu.memory_space<vmem>>, vector<8x128xf32>
      %49 = arith.mulf %27, %41 : vector<16x128xf32>
      %50 = vector.shape_cast %49 : vector<16x128xf32> to vector<2x8x128xf32>
      %cst_25 = arith.constant dense<0.000000e+00> : vector<8x128xf32>
      %51 = vector.multi_reduction <add>, %50, %cst_25 [0] : vector<2x8x128xf32> to vector<8x128xf32>
      %52 = arith.addf %48, %51 : vector<8x128xf32>
      %c0_26 = arith.constant 0 : index
      %c0_27 = arith.constant 0 : index
      %53 = vector.load %arg8[%c0_26, %c0_27] : memref<8x128xf32, #tpu.memory_space<vmem>>, vector<8x128xf32>
      tpu.vector_store %arg8[%c0_26, %c0_27], %52 {strides = array<i32>} : memref<8x128xf32, #tpu.memory_space<vmem>>, vector<8x128xf32>,
      %c0_28 = arith.constant 0 : index
      %c0_29 = arith.constant 0 : index
      %54 = vector.load %arg9[%c0_28, %c0_29] : memref<8x128xf32, #tpu.memory_space<vmem>>, vector<8x128xf32>
      %55 = arith.mulf %31, %42 : vector<16x128xf32>
      %56 = vector.shape_cast %55 : vector<16x128xf32> to vector<2x8x128xf32>
      %cst_30 = arith.constant dense<0.000000e+00> : vector<8x128xf32>
      %57 = vector.multi_reduction <add>, %56, %cst_30 [0] : vector<2x8x128xf32> to vector<8x128xf32>
      %58 = arith.addf %54, %57 : vector<8x128xf32>
      %c0_31 = arith.constant 0 : index
      %c0_32 = arith.constant 0 : index
      %59 = vector.load %arg9[%c0_31, %c0_32] : memref<8x128xf32, #tpu.memory_space<vmem>>, vector<8x128xf32>
      tpu.vector_store %arg9[%c0_31, %c0_32], %58 {strides = array<i32>} : memref<8x128xf32, #tpu.memory_space<vmem>>, vector<8x128xf32>,
    } else {
    }
    %c0_i32_5 = arith.constant 0 : i32
    %13 = arith.cmpi eq, %arg1, %c0_i32_5 : i32
    %14 = arith.extui %13 : i1 to i32
    %c0_i32_6 = arith.constant 0 : i32
    %15 = arith.cmpi ne, %14, %c0_i32_6 : i32
    scf.if %15 {
      %c0 = arith.constant 0 : index
      %c0_7 = arith.constant 0 : index
      %16 = vector.load %arg7[%c0, %c0_7] : memref<8x128xf32, #tpu.memory_space<vmem>>, vector<8x128xf32>
      %17 = vector.shape_cast %16 : vector<8x128xf32> to vector<1x8x128xf32>
      %c0_8 = arith.constant 0 : index
      %c0_9 = arith.constant 0 : index
      %c0_10 = arith.constant 0 : index
      %18 = vector.load %arg4[%c0_8, %c0_9, %c0_10] : memref<1x8x128xf32, #tpu.memory_space<vmem>>, vector<1x8x128xf32>
      tpu.vector_store %arg4[%c0_8, %c0_9, %c0_10], %17 {strides = array<i32>} : memref<1x8x128xf32, #tpu.memory_space<vmem>>, vector<1x8x128xf32>,
      %c0_11 = arith.constant 0 : index
      %c0_12 = arith.constant 0 : index
      %19 = vector.load %arg8[%c0_11, %c0_12] : memref<8x128xf32, #tpu.memory_space<vmem>>, vector<8x128xf32>
      %20 = vector.shape_cast %19 : vector<8x128xf32> to vector<1x8x128xf32>
      %c0_13 = arith.constant 0 : index
      %c0_14 = arith.constant 0 : index
      %c0_15 = arith.constant 0 : index
      %21 = vector.load %arg5[%c0_13, %c0_14, %c0_15] : memref<1x8x128xf32, #tpu.memory_space<vmem>>, vector<1x8x128xf32>
      tpu.vector_store %arg5[%c0_13, %c0_14, %c0_15], %20 {strides = array<i32>} : memref<1x8x128xf32, #tpu.memory_space<vmem>>, vector<1x8x128xf32>,
      %c0_16 = arith.constant 0 : index
      %c0_17 = arith.constant 0 : index
      %22 = vector.load %arg9[%c0_16, %c0_17] : memref<8x128xf32, #tpu.memory_space<vmem>>, vector<8x128xf32>
      %23 = vector.shape_cast %22 : vector<8x128xf32> to vector<1x8x128xf32>
      %c0_18 = arith.constant 0 : index
      %c0_19 = arith.constant 0 : index
      %c0_20 = arith.constant 0 : index
      %24 = vector.load %arg6[%c0_18, %c0_19, %c0_20] : memref<1x8x128xf32, #tpu.memory_space<vmem>>, vector<1x8x128xf32>
      tpu.vector_store %arg6[%c0_18, %c0_19, %c0_20], %23 {strides = array<i32>} : memref<1x8x128xf32, #tpu.memory_space<vmem>>, vector<1x8x128xf32>,
    } else {
    }
    return
  }
  func.func @transform_0(%arg0: i32, %arg1: i32) -> (i32, i32) {
    %c1_i32 = arith.constant 1 : i32
    %0 = arith.muli %arg0, %c1_i32 : i32
    %1 = arith.addi %0, %arg1 : i32
    %c0_i32 = arith.constant 0 : i32
    %2 = arith.minsi %1, %c0_i32 : i32
    %c0_i32_0 = arith.constant 0 : i32
    %c0_i32_1 = arith.constant 0 : i32
    return %2, %c0_i32_0 : i32, i32
  }
  func.func @transform_1(%arg0: i32, %arg1: i32) -> (i32, i32) {
    %c1_i32 = arith.constant 1 : i32
    %0 = arith.muli %arg0, %c1_i32 : i32
    %1 = arith.addi %0, %arg1 : i32
    %c0_i32 = arith.constant 0 : i32
    %2 = arith.minsi %1, %c0_i32 : i32
    %c0_i32_0 = arith.constant 0 : i32
    %c0_i32_1 = arith.constant 0 : i32
    return %2, %c0_i32_0 : i32, i32
  }
  func.func @transform_2(%arg0: i32, %arg1: i32) -> (i32, i32, i32) {
    %c0_i32 = arith.constant 0 : i32
    %c0_i32_0 = arith.constant 0 : i32
    %c0_i32_1 = arith.constant 0 : i32
    return %arg0, %c0_i32, %c0_i32_0 : i32, i32, i32
  }
  func.func @transform_3(%arg0: i32, %arg1: i32) -> (i32, i32, i32) {
    %c0_i32 = arith.constant 0 : i32
    %c0_i32_0 = arith.constant 0 : i32
    %c0_i32_1 = arith.constant 0 : i32
    return %arg0, %c0_i32, %c0_i32_0 : i32, i32, i32
  }
  func.func @transform_4(%arg0: i32, %arg1: i32) -> (i32, i32, i32) {
    %c0_i32 = arith.constant 0 : i32
    %c0_i32_0 = arith.constant 0 : i32
    %c0_i32_1 = arith.constant 0 : i32
    return %arg0, %c0_i32, %c0_i32_0 : i32, i32, i32
  }
}

</mosaic_0001>

<bundles_post_ra>
// kernel: tpu_custom_call.1
= control target key start
LH: loop header
LB: loop body
LE: loop exit
PB: predicated region body
PF: predicated region fallthrough
CT: control target
= control target key end

     0   :  { %10 = vsyncpa [#allocation6], 0  ;;  %s434_s0 = inlined_call_operand.hbm [shape: f32[16,128], index: 0, kind: input, shape index: {}]   ;;  %s435_s1 = inlined_call_operand.hbm [shape: f32[16,128], index: 1, kind: input, shape index: {}]   ;;  %s436_s2 = inlined_call_operand.hbm [shape: f32[1,8,128], index: 2, kind: output, shape index: {0}]   ;;  %s437_s3 = inlined_call_operand.hbm [shape: f32[1,8,128], index: 3, kind: output, shape index: {1}]   ;;  %s438_s4 = inlined_call_operand.hbm [shape: f32[1,8,128], index: 4, kind: output, shape index: {2}]  }
   0x1   :  { %11 = vsyncpa [#allocation9], 0 }
   0x2   :  { %12 = vsyncpa [#allocation7], 0 }
   0x3   :  { %13 = vsyncpa [#allocation12], 0  ;;  %s387_s15 = smov [#allocation5]  }
   0x4   :  { %s25_s16 = sshll.u32 %s387_s15, 4  ;;  %s26_s16 = int_to_ptr.vmem [resolvable:$true] %s25_s16 }
   0x5   :  { %s287_s17 = scalar_lea.vmem %s26_s16, 256  ;;  %p292_p1 = scmp.lt.s32.totalorder %s26_s16, %s26_s16 }
   0x6   :  { %p288_p0 = scmp.ne.s32.totalorder %s26_s16, %s287_s17  ;;  %p293_p2 = scmp.lt.s32.totalorder %s287_s17, %s287_s17 }
   0x8   :  { %p294_p3 = por %p293_p2, %p292_p1 }
   0xa   :  { %p295_p4 = pnand %p294_p3, %p288_p0 }
   0xc   :  { %298 = shalt.err (!%p295_p4)
}
   0xd   :  { %s388_s18 = smov 128   ;;  %s389_s19 = smov 8  }
   0xe   :  { %31 = dma.hbm_to_vmem [thread:$0]  %s434_s0, 256, %s26_s16, [#allocation6], %s388_s18, %s388_s18, %s389_s19  }
   0xf   :  { %s390_s22 = smov [#allocation8]  }
  0x10   :  { %s43_s23 = sshll.u32 %s390_s22, 4  ;;  %s44_s23 = int_to_ptr.vmem [resolvable:$true] %s43_s23 }
  0x11   :  { %s307_s24 = scalar_lea.vmem %s44_s23, 256  ;;  %p312_p6 = scmp.lt.s32.totalorder %s44_s23, %s44_s23 }
  0x12   :  { %p308_p5 = scmp.ne.s32.totalorder %s44_s23, %s307_s24  ;;  %p313_p7 = scmp.lt.s32.totalorder %s307_s24, %s307_s24 }
  0x14   :  { %p314_p8 = por %p313_p7, %p312_p6 }
  0x16   :  { %p315_p9 = pnand %p314_p8, %p308_p5 }
  0x18   :  { %318 = shalt.err (!%p315_p9)
}
  0x19   :  { %49 = dma.hbm_to_vmem [thread:$0]  %s435_s1, 256, %s44_s23, [#allocation9], %s388_s18, %s388_s18, %s389_s19  }
  0x1a   :  { %379 = dma.done.wait [#allocation6], 256  }
  0x1b   :  { %380 = vsyncadd [#allocation6], 4294967040 }
  0x1c   :  { %381 = dma.done.wait [#allocation9], 256  }
  0x1d   :  { %382 = vsyncadd [#allocation9], 4294967040  ;;  %s391_s27 = smov [#allocation10]   ;;  %v78_v0 = vld [vmem:[#allocation5] sm:$0xff]  ;;  %v79_v1 = vld [vmem:[#allocation5 + $0x8] sm:$0xff] }
  0x1e   :  { %s223_s0 = sshll.u32 %s391_s27, 4  ;;  %v80_v2 = vld [vmem:[#allocation8] sm:$0xff]  ;;  %v81_v3 = vld [vmem:[#allocation8 + $0x8] sm:$0xff]  ;;  %v88_v4 = vand.u32 2147483647, %v78_v0  ;;  %s224_s0 = int_to_ptr.vmem [resolvable:$true] %s223_s0 }
  0x1f   :  { %v89_v5 = vand.u32 2147483647, %v79_v1  ;;  %v119_v6 = vadd.f32 %v81_v3, %v80_v2  ;;  %s319_s28 = scalar_lea.vmem %s224_s0, 128  ;;  %p324_p11 = scmp.lt.s32.totalorder %s224_s0, %s224_s0 }
  0x20   :  { %v90_v7 = vsub.f32 0.0, %v88_v4  ;;  %p320_p10 = scmp.ne.s32.totalorder %s224_s0, %s319_s28  ;;  %p325_p12 = scmp.lt.s32.totalorder %s319_s28, %s319_s28 }
  0x21   :  { %v91_v8 = vsub.f32 0.0, %v89_v5  ;;  %212 = vst [vmem:[#allocation10] sm:$0xff] %v119_v6 }
  0x22   :  { %v92_v9 = vmul.f32 1.442695, %v90_v7  ;;  %p326_p13 = por %p325_p12, %p324_p11 }
  0x24   :  { %p327_p0 = pnand %p326_p13, %p320_p10 }
  0x26   :  { %330 = shalt.err (!%p327_p0)
}
  0x27   :  { %226 = dma.vmem_to_hbm [thread:$0]  %s224_s0, 128, %s436_s2, [#allocation7]   ;;  %v94_v10 = vmul.f32 1.442695, %v91_v8  ;;  %271 = vpow2.f32 %v92_v9  ;;  %v84_v18 = vsub.f32 0.0, %v78_v0  ;;  %v85_v21 = vsub.f32 0.0, %v79_v1 }
  0x28   :  { %v82_v34 = vsub.f32 1.0, %v80_v2  ;;  %v83_v36 = vsub.f32 1.0, %v81_v3  ;;  %s392_s2 = smov [#allocation11]   ;;  %s393_s5 = smov [#allocation13]  }
  0x29   :  { %273 = vpow2.f32 %v94_v10  ;;  %v86_v25 = vmax.f32 %v84_v18, 0.0  ;;  %v87_v28 = vmax.f32 %v85_v21, 0.0  ;;  %s233_s30 = sshll.u32 %s392_s2, 4  ;;  %s243_s6 = sshll.u32 %s393_s5, 4  ;;  %s234_s30 = int_to_ptr.vmem [resolvable:$true] %s233_s30  ;;  %s244_s6 = int_to_ptr.vmem [resolvable:$true] %s243_s6 }
  0x2a   :  { %s339_s7 = scalar_lea.vmem %s234_s30, 128  ;;  %p344_p2 = scmp.lt.s32.totalorder %s234_s30, %s234_s30 }
  0x2b   :  { %p340_p1 = scmp.ne.s32.totalorder %s234_s30, %s339_s7  ;;  %p345_p3 = scmp.lt.s32.totalorder %s339_s7, %s339_s7 }
  0x2d   :  { %p346_p4 = por %p345_p3, %p344_p2 }
  0x2f   :  { %p347_p5 = pnand %p346_p4, %p340_p1 }
  0x34   :  { %v272_v11 = vpop.eup %271 }
  0x35   :  { %v96_v13 = vadd.f32 1.0, %v272_v11  ;;  %v99_v15 = vmul.f32 -0.5, %v272_v11  ;;  %v102_v19 = vand.u32 2147483647, %v272_v11 }
  0x36   :  { %v274_v12 = vpop.eup %273 }
  0x37   :  { %v105_v14 = vadd.f32 1.0, %v274_v12  ;;  %275 = vlog2.f32 %v96_v13  ;;  %v108_v16 = vmul.f32 -0.5, %v274_v12  ;;  %v100_v17 = vadd.f32 1.0, %v99_v15 }
  0x38   :  { %v111_v22 = vand.u32 2147483647, %v274_v12  ;;  %vm103_vm0 = vcmp.lt.f32.partialorder %v102_v19, 0.0004427343 }
  0x39   :  { %277 = vlog2.f32 %v105_v14  ;;  %v109_v20 = vadd.f32 1.0, %v108_v16  ;;  %v101_v23 = vmul.f32 %v272_v11, %v100_v17 }
  0x3a   :  { %vm112_vm1 = vcmp.lt.f32.partialorder %v111_v22, 0.0004427343 }
  0x3b   :  { %v110_v26 = vmul.f32 %v274_v12, %v109_v20 }
  0x44   :  { %v276_v24 = vpop.eup %275 }
  0x45   :  { %v98_v29 = vmul.f32 0.6931472, %v276_v24 }
  0x46   :  { %v278_v27 = vpop.eup %277 }
  0x47   :  { %v107_v30 = vmul.f32 0.6931472, %v278_v27  ;;  %v104_v31 = vsel %vm103_vm0, %v101_v23, %v98_v29 }
  0x48   :  { %v114_v33 = vadd.f32 %v104_v31, %v86_v25 }
  0x49   :  { %v113_v32 = vsel %vm112_vm1, %v110_v26, %v107_v30 }
  0x4a   :  { %v115_v35 = vadd.f32 %v113_v32, %v87_v28  ;;  %v123_v37 = vmul.f32 %v114_v33, %v80_v2  ;;  %v116_v38 = vadd.f32 %v114_v33, %v78_v0 }
  0x4c   :  { %v124_v39 = vmul.f32 %v115_v35, %v81_v3  ;;  %v117_v40 = vadd.f32 %v115_v35, %v79_v1  ;;  %v129_v41 = vmul.f32 %v116_v38, %v82_v34 }
  0x4e   :  { %v125_v42 = vadd.f32 %v124_v39, %v123_v37  ;;  %v130_v43 = vmul.f32 %v117_v40, %v83_v36 }
  0x50   :  { %214 = vst [vmem:[#allocation11] sm:$0xff] %v125_v42  ;;  %v131_v44 = vadd.f32 %v130_v43, %v129_v41 }
  0x51   :  { %350 = shalt.err (!%p347_p5)
}
  0x52   :  { %236 = dma.vmem_to_hbm [thread:$0]  %s234_s30, 128, %s437_s3, [#allocation12]   ;;  %216 = vst [vmem:[#allocation13] sm:$0xff] %v131_v44 }
  0x53   :  { %s359_s10 = scalar_lea.vmem %s244_s6, 128  ;;  %p364_p7 = scmp.lt.s32.totalorder %s244_s6, %s244_s6 }
  0x54   :  { %p360_p6 = scmp.ne.s32.totalorder %s244_s6, %s359_s10  ;;  %p365_p8 = scmp.lt.s32.totalorder %s359_s10, %s359_s10 }
  0x56   :  { %p366_p9 = por %p365_p8, %p364_p7 }
  0x58   :  { %p367_p10 = pnand %p366_p9, %p360_p6 }
  0x5a   :  { %370 = shalt.err (!%p367_p10)
}
  0x5b   :  { %246 = dma.vmem_to_hbm [thread:$0]  %s244_s6, 128, %s438_s4, [#allocation12]  }
  0x5c   :  { %383 = dma.done.wait [#allocation7], 128  }
  0x5d   :  { %384 = vsyncadd [#allocation7], 4294967168 }
  0x5e   :  { %385 = dma.done.wait [#allocation12], 256  }
  0x5f   :  { %386 = vsyncadd [#allocation12], 4294967040 }
  0x60   :  { %256 = vsyncpa [#allocation6], 1 }
  0x61   :  { %257 = vsyncpa [#allocation9], 1 }
  0x62   :  { %258 = vsyncpa [#allocation7], 1 }
  0x63   :  { %259 = vsyncpa [#allocation12], 1 }

</bundles_post_ra>
